<compile_context>
chip_gen: v6e
topology: v6e:2x2x1
jax: 0.10.0
libtpu: 0.0.40
codegen_flags: <defaults>
</compile_context>

<pallas_src>
import functools

import jax
import jax.numpy as jnp
from jax.experimental import pallas as pl
from jax.experimental.pallas import tpu as pltpu


def _round_up(x: int, m: int) -> int:
    return ((x + m - 1) // m) * m


def _vmem_capacity_bytes() -> int:
    """Physical VMEM of the current TPU generation (conservative fallback)."""
    try:
        cap = getattr(pltpu.get_tpu_info(), "vmem_capacity_bytes", None)
        if cap:
            return int(cap)
    except Exception:
        pass
    return 64 << 20  # v7x per-TensorCore size: safe lower bound everywhere


def _ffn_kernel(x_ref, w1_ref, b1a_ref, w2_ref, p_ref, o_ref, *,
                eps: float, matmul_dtype):
    # Load the activation tile once; cast to bf16 IN-KERNEL for the MXU
    # (no wrapper-side cast pass over HBM).
    x = x_ref[...]
    x_f32 = x.astype(jnp.float32)
    x_mm = x.astype(matmul_dtype)

    w1 = w1_ref[...]
    if w1.dtype != matmul_dtype:          # producer should supply bf16 weights;
        w1 = w1.astype(matmul_dtype)      # fall back to an in-kernel cast.
    w2 = w2_ref[...]
    if w2.dtype != matmul_dtype:
        w2 = w2.astype(matmul_dtype)

    # Intermediate dense: [tm, H] @ [H, I] -> f32 accumulation on the MXU.
    inter = jnp.dot(x_mm, w1, preferred_element_type=jnp.float32)
    inter = inter + b1a_ref[0:1, :]
    # PReLU (single shared alpha, broadcast as a constant row along I).
    alpha_row = b1a_ref[1:2, :]
    inter = jnp.where(inter >= 0, inter, alpha_row * inter)

    # Output dense: [tm, I] @ [I, H] -> f32 accumulation on the MXU.
    y = jnp.dot(inter.astype(matmul_dtype), w2,
                preferred_element_type=jnp.float32)
    y = y + p_ref[0:1, :]

    # TODO(synk): dropout is identity here (inference semantics); training-mode
    # dropout would use pltpu.prng_seed / pltpu.stateful_bernoulli.

    # Residual add in f32.
    y = y + x_f32

    # LayerNorm over the hidden axis: single fused pass (sum + sum-of-squares),
    # f32 statistics.
    inv_h = 1.0 / y.shape[-1]
    s1 = jnp.sum(y, axis=-1, keepdims=True)
    s2 = jnp.sum(y * y, axis=-1, keepdims=True)
    mean = s1 * inv_h
    var = s2 * inv_h - mean * mean
    inv = jax.lax.rsqrt(var + eps)
    out = (y - mean) * inv * p_ref[1:2, :] + p_ref[2:3, :]

    o_ref[...] = out.astype(o_ref.dtype)


def bert_ffn_lc(x, w1_t, b1, prelu_alpha, w2_t, b2, gamma, beta,
                *, eps=1e-12, tm=512, matmul_dtype=jnp.bfloat16,
                out_dtype=None):
    """Fused BertLayerLC feed-forward chunk.

    x        : [M, H]  attention output (also the residual), M = batch*seq
    w1_t     : [H, I]  intermediate weight, pre-transposed (ideally bf16)
    b1       : [I]
    prelu_alpha: scalar (or shape-(1,)) PReLU weight
    w2_t     : [I, H]  output weight, pre-transposed (ideally bf16)
    b2, gamma, beta : [H]
    """
    M, H = x.shape
    H2, I = w1_t.shape
    assert H2 == H and w2_t.shape == (I, H)
    assert b1.shape == (I,) and b2.shape == (H,)
    assert gamma.shape == (H,) and beta.shape == (H,)

    out_dtype = out_dtype or x.dtype

    alpha = jnp.asarray(prelu_alpha, jnp.float32).reshape(())
    b1a = jnp.stack([b1.astype(jnp.float32),
                     jnp.broadcast_to(alpha, (I,))])            # (2, I)
    params = jnp.stack([b2, gamma, beta]).astype(jnp.float32)   # (3, H)

    # Row tile: large by default, shrunk for small M; guarantee >= 2 grid steps
    # when possible so v7x can shard the "parallel" row axis across its 2 TCs.
    tm_eff = min(tm, _round_up(M, 8))
    if pl.cdiv(M, tm_eff) < 2 and M > 8:
        tm_eff = _round_up(pl.cdiv(M, 2), 8)

    mm_b = jnp.dtype(matmul_dtype).itemsize
    x_b = jnp.dtype(x.dtype).itemsize
    o_b = jnp.dtype(out_dtype).itemsize
    w1_b = jnp.dtype(w1_t.dtype).itemsize
    w2_b = jnp.dtype(w2_t.dtype).itemsize

    # Single-buffered resident operands (weights + padded small-param tiles).
    resident = (H * I * w1_b + I * H * w2_b
                + 8 * _round_up(I, 128) * 4
                + 8 * _round_up(H, 128) * 4)

    def vmem_needed(tm_e):
        tiles = 2 * tm_e * H * (x_b + o_b)          # double-buffered x / out
        body = tm_e * I * (4 + mm_b)                # inter f32 + bf16 copy
        body += tm_e * H * (3 * 4 + mm_b)           # f32 temporaries + bf16 x
        return tiles + resident + body

    # Generation-aware budget: 85% of physical VMEM (v5e/v6e 128 MiB keep big
    # tiles; v7x 64 MiB leaves headroom for compiler-internal scratch), then
    # auto-shrink tm until the tile budget (plus headroom) fits.
    budget = int(_vmem_capacity_bytes() * 0.85)
    while tm_eff > 8 and vmem_needed(tm_eff) * 5 // 4 > budget:
        tm_eff = max(8, _round_up(tm_eff // 2, 8))
    vmem_limit = int(min(budget,
                         max(vmem_needed(tm_eff) * 5 // 4 + (2 << 20),
                             16 << 20)))

    grid_m = pl.cdiv(M, tm_eff)   # ragged tail handled by Pallas block masking

    cost = pl.CostEstimate(
        flops=4 * M * H * I,                    # two matmuls
        transcendentals=M,                      # rsqrt per row
        bytes_accessed=(M * H * (x_b + o_b) + H * I * w1_b + I * H * w2_b
                        + (2 * I + 3 * H) * 4),
    )

    kernel = functools.partial(_ffn_kernel, eps=eps, matmul_dtype=matmul_dtype)

    # NOTE(perf): the Buffered(1) grid-invariant blocks (weights / params) are
    # assumed to be DMA'd once and stay resident across grid steps (index_map
    # is constant).  If a profile ever shows per-step re-fetch, the fallback is
    # memory_space=pl.ANY + one pltpu.sync_copy into a VMEM scratch under
    # pl.when(pl.program_id(0) == 0).
    out = pl.pallas_call(
        kernel,
        out_shape=jax.ShapeDtypeStruct((M, H), out_dtype),
        grid_spec=pltpu.PrefetchScalarGridSpec(
            num_scalar_prefetch=0,
            grid=(grid_m,),
            in_specs=[
                # Per-tile activation: default double-buffered pipeline.
                pl.BlockSpec((tm_eff, H), lambda i: (i, 0)),
                # Grid-invariant operands: single buffer (no wasted VMEM).
                pl.BlockSpec((H, I), lambda i: (0, 0),
                             pipeline_mode=pl.Buffered(1)),
                pl.BlockSpec((2, I), lambda i: (0, 0),
                             pipeline_mode=pl.Buffered(1)),
                pl.BlockSpec((I, H), lambda i: (0, 0),
                             pipeline_mode=pl.Buffered(1)),
                pl.BlockSpec((3, H), lambda i: (0, 0),
                             pipeline_mode=pl.Buffered(1)),
            ],
            out_specs=pl.BlockSpec((tm_eff, H), lambda i: (i, 0)),
        ),
        compiler_params=pltpu.CompilerParams(
            dimension_semantics=("parallel",),
            vmem_limit_bytes=vmem_limit,
        ),
        cost_estimate=cost,
    )(x, w1_t, b1a, w2_t, params)

    return out


def reference(x, w1_t, b1, alpha, w2_t, b2, gamma, beta, eps=1e-12,
              matmul_dtype=jnp.bfloat16):
    """Pure-JAX reference with the same bf16 matmul operands / f32 accumulation."""
    inter = jnp.dot(x.astype(matmul_dtype), w1_t.astype(matmul_dtype),
                    preferred_element_type=jnp.float32) + b1
    inter = jnp.where(inter >= 0, inter, alpha * inter)
    y = jnp.dot(inter.astype(matmul_dtype), w2_t.astype(matmul_dtype),
                preferred_element_type=jnp.float32) + b2
    y = y + x.astype(jnp.float32)
    mean = jnp.mean(y, axis=-1, keepdims=True)
    var = jnp.mean((y - mean) ** 2, axis=-1, keepdims=True)
    return (y - mean) * jax.lax.rsqrt(var + eps) * gamma + beta


if __name__ == "__main__":
    # Small BERT-like config: batch=2, seq=8, hidden=32, intermediate=128.
    batch, seq, hidden, intermediate = 2, 8, 32, 128
    eps = 1e-12
    M = batch * seq

    key = jax.random.PRNGKey(0)
    k1, k2, k3, k4, k5 = jax.random.split(key, 5)

    x = jax.random.normal(k1, (batch, seq, hidden), jnp.float32)

    # nn.Linear-style params; weights are pre-transposed and stored in bf16 by
    # the producer, so no per-call cast pass is needed anywhere.
    w1_t = (jax.random.normal(k2, (hidden, intermediate), jnp.float32)
            * (1.0 / jnp.sqrt(hidden))).astype(jnp.bfloat16)
    b1 = jax.random.normal(k3, (intermediate,), jnp.float32) * 0.01
    prelu_alpha = jnp.array([0.01], jnp.float32)     # nn.PReLU(1, init=0.01)
    w2_t = (jax.random.normal(k4, (intermediate, hidden), jnp.float32)
            * (1.0 / jnp.sqrt(intermediate))).astype(jnp.bfloat16)
    b2 = jax.random.normal(k5, (hidden,), jnp.float32) * 0.01
    gamma = jnp.ones((hidden,), jnp.float32)          # LayerNorm weight
    beta = jnp.zeros((hidden,), jnp.float32)          # LayerNorm bias

    x2 = x.reshape(M, hidden)

    out = bert_ffn_lc(x2, w1_t, b1, prelu_alpha, w2_t, b2, gamma, beta, eps=eps)
    out = jax.block_until_ready(out)
    out3 = out.reshape(batch, seq, hidden)

    ref = reference(x2, w1_t, b1, prelu_alpha[0], w2_t, b2, gamma, beta, eps)
    ref3 = ref.reshape(batch, seq, hidden)
    assert out3.shape == (batch, seq, hidden)
    assert jnp.allclose(out3.astype(jnp.float32), ref3, atol=2e-2, rtol=2e-2), \
        "mismatch vs reference"

    # Ragged-M path (no jnp.pad): 18 rows -> 2-step grid with a partial last
    # block; Pallas masks the tail write-back.
    xr = jax.random.normal(jax.random.PRNGKey(1), (18, hidden), jnp.float32)
    out_r = jax.block_until_ready(
        bert_ffn_lc(xr, w1_t, b1, prelu_alpha, w2_t, b2, gamma, beta, eps=eps))
    ref_r = reference(xr, w1_t, b1, prelu_alpha[0], w2_t, b2, gamma, beta, eps)
    assert jnp.allclose(out_r.astype(jnp.float32), ref_r, atol=2e-2, rtol=2e-2), \
        "mismatch vs reference (ragged M)"

    # TODO(synk): BertAttention (self/cross attention, KV cache) is not part of
    # the provided spec and is not implemented here.
    print("KERNEL_OK")
</pallas_src>

<mosaic_0001>
module attributes {stable_mosaic.version = 11 : i64} {
  func.func @_ffn_kernel(%arg0: i32, %arg1: memref<8x32xf32, #tpu.memory_space<vmem>>, %arg2: memref<32x128xbf16, #tpu.memory_space<vmem>>, %arg3: memref<2x128xf32, #tpu.memory_space<vmem>>, %arg4: memref<128x32xbf16, #tpu.memory_space<vmem>>, %arg5: memref<3x32xf32, #tpu.memory_space<vmem>>, %arg6: memref<8x32xf32, #tpu.memory_space<vmem>>) attributes {dimension_semantics = [#tpu.dimension_semantics<parallel>], iteration_bounds = array<i64: 2>, scalar_prefetch = 0 : i64, scratch_operands = 0 : i64, tpu.core_type = #tpu.core_type<tc>, window_params = [{transform_indices = @transform_0, window_bounds = array<i64: 8, 32>}, {pipeline_mode = #tpu.pipeline_mode<synchronous>, transform_indices = @transform_1, window_bounds = array<i64: 32, 128>}, {pipeline_mode = #tpu.pipeline_mode<synchronous>, transform_indices = @transform_2, window_bounds = array<i64: 2, 128>}, {pipeline_mode = #tpu.pipeline_mode<synchronous>, transform_indices = @transform_3, window_bounds = array<i64: 128, 32>}, {pipeline_mode = #tpu.pipeline_mode<synchronous>, transform_indices = @transform_4, window_bounds = array<i64: 3, 32>}, {transform_indices = @transform_5, window_bounds = array<i64: 8, 32>}]} {
    %c0 = arith.constant 0 : index
    %c0_0 = arith.constant 0 : index
    %0 = vector.load %arg1[%c0, %c0_0] : memref<8x32xf32, #tpu.memory_space<vmem>>, vector<8x32xf32>
    %1 = arith.truncf %0 : vector<8x32xf32> to vector<8x32xbf16>
    %c0_1 = arith.constant 0 : index
    %c0_2 = arith.constant 0 : index
    %2 = vector.load %arg2[%c0_1, %c0_2] : memref<32x128xbf16, #tpu.memory_space<vmem>>, vector<32x128xbf16>
    %c0_3 = arith.constant 0 : index
    %c0_4 = arith.constant 0 : index
    %3 = vector.load %arg4[%c0_3, %c0_4] : memref<128x32xbf16, #tpu.memory_space<vmem>>, vector<128x32xbf16>
    %cst = arith.constant dense<0.000000e+00> : vector<8x128xf32>
    %4 = tpu.matmul %1, %2, %cst {dimension_numbers = #tpu.dot_dimension_numbers<[1], [0], [0], [1], [0, 0, 1, 1], [], []>} : vector<8x32xbf16>, vector<32x128xbf16>, vector<8x128xf32> -> vector<8x128xf32>
    %c0_5 = arith.constant 0 : index
    %c0_6 = arith.constant 0 : index
    %5 = vector.load %arg3[%c0_5, %c0_6] : memref<2x128xf32, #tpu.memory_space<vmem>>, vector<1x128xf32>
    %6 = vector.broadcast %5 : vector<1x128xf32> to vector<8x128xf32>
    %7 = arith.addf %4, %6 : vector<8x128xf32>
    %c1 = arith.constant 1 : index
    %c0_7 = arith.constant 0 : index
    %8 = vector.load %arg3[%c1, %c0_7] : memref<2x128xf32, #tpu.memory_space<vmem>>, vector<1x128xf32>
    %cst_8 = arith.constant 0.000000e+00 : f32
    %9 = vector.broadcast %cst_8 : f32 to vector<8x128xf32>
    %10 = arith.cmpf oge, %7, %9 : vector<8x128xf32>
    %11 = vector.broadcast %8 : vector<1x128xf32> to vector<8x128xf32>
    %12 = arith.mulf %11, %7 : vector<8x128xf32>
    %13 = arith.select %10, %7, %12 : vector<8x128xi1>, vector<8x128xf32>
    %14 = arith.truncf %13 : vector<8x128xf32> to vector<8x128xbf16>
    %cst_9 = arith.constant dense<0.000000e+00> : vector<8x32xf32>
    %15 = tpu.matmul %14, %3, %cst_9 {dimension_numbers = #tpu.dot_dimension_numbers<[1], [0], [0], [1], [0, 0, 1, 1], [], []>} : vector<8x128xbf16>, vector<128x32xbf16>, vector<8x32xf32> -> vector<8x32xf32>
    %c0_10 = arith.constant 0 : index
    %c0_11 = arith.constant 0 : index
    %16 = vector.load %arg5[%c0_10, %c0_11] : memref<3x32xf32, #tpu.memory_space<vmem>>, vector<1x32xf32>
    %17 = vector.broadcast %16 : vector<1x32xf32> to vector<8x32xf32>
    %18 = arith.addf %15, %17 : vector<8x32xf32>
    %19 = arith.addf %18, %0 : vector<8x32xf32>
    %cst_12 = arith.constant dense<0.000000e+00> : vector<8xf32>
    %20 = vector.multi_reduction <add>, %19, %cst_12 [1] : vector<8x32xf32> to vector<8xf32>
    %21 = vector.shape_cast %20 : vector<8xf32> to vector<8x1xf32>
    %22 = arith.mulf %19, %19 : vector<8x32xf32>
    %cst_13 = arith.constant dense<0.000000e+00> : vector<8xf32>
    %23 = vector.multi_reduction <add>, %22, %cst_13 [1] : vector<8x32xf32> to vector<8xf32>
    %24 = vector.shape_cast %23 : vector<8xf32> to vector<8x1xf32>
    %cst_14 = arith.constant 3.125000e-02 : f32
    %25 = vector.broadcast %cst_14 : f32 to vector<8x1xf32>
    %26 = arith.mulf %21, %25 : vector<8x1xf32>
    %cst_15 = arith.constant 3.125000e-02 : f32
    %27 = vector.broadcast %cst_15 : f32 to vector<8x1xf32>
    %28 = arith.mulf %24, %27 : vector<8x1xf32>
    %29 = arith.mulf %26, %26 : vector<8x1xf32>
    %30 = arith.subf %28, %29 : vector<8x1xf32>
    %cst_16 = arith.constant 9.99999996E-13 : f32
    %31 = vector.broadcast %cst_16 : f32 to vector<8x1xf32>
    %32 = arith.addf %30, %31 : vector<8x1xf32>
    %33 = math.rsqrt %32 : vector<8x1xf32>
    %34 = vector.broadcast %26 : vector<8x1xf32> to vector<8x32xf32>
    %35 = arith.subf %19, %34 : vector<8x32xf32>
    %36 = vector.broadcast %33 : vector<8x1xf32> to vector<8x32xf32>
    %37 = arith.mulf %35, %36 : vector<8x32xf32>
    %c1_17 = arith.constant 1 : index
    %c0_18 = arith.constant 0 : index
    %38 = vector.load %arg5[%c1_17, %c0_18] : memref<3x32xf32, #tpu.memory_space<vmem>>, vector<1x32xf32>
    %39 = vector.broadcast %38 : vector<1x32xf32> to vector<8x32xf32>
    %40 = arith.mulf %37, %39 : vector<8x32xf32>
    %c2 = arith.constant 2 : index
    %c0_19 = arith.constant 0 : index
    %41 = vector.load %arg5[%c2, %c0_19] : memref<3x32xf32, #tpu.memory_space<vmem>>, vector<1x32xf32>
    %42 = vector.broadcast %41 : vector<1x32xf32> to vector<8x32xf32>
    %43 = arith.addf %40, %42 : vector<8x32xf32>
    %c0_20 = arith.constant 0 : index
    %c0_21 = arith.constant 0 : index
    %44 = vector.load %arg6[%c0_20, %c0_21] : memref<8x32xf32, #tpu.memory_space<vmem>>, vector<8x32xf32>
    tpu.vector_store %arg6[%c0_20, %c0_21], %43 {strides = array<i32>} : memref<8x32xf32, #tpu.memory_space<vmem>>, vector<8x32xf32>,
    return
  }
  func.func @transform_0(%arg0: i32) -> (i32, i32) {
    %c0_i32 = arith.constant 0 : i32
    %c0_i32_0 = arith.constant 0 : i32
    return %arg0, %c0_i32 : i32, i32
  }
  func.func @transform_1(%arg0: i32) -> (i32, i32) {
    %c0_i32 = arith.constant 0 : i32
    %c0_i32_0 = arith.constant 0 : i32
    %c0_i32_1 = arith.constant 0 : i32
    return %c0_i32, %c0_i32_0 : i32, i32
  }
  func.func @transform_2(%arg0: i32) -> (i32, i32) {
    %c0_i32 = arith.constant 0 : i32
    %c0_i32_0 = arith.constant 0 : i32
    %c0_i32_1 = arith.constant 0 : i32
    return %c0_i32, %c0_i32_0 : i32, i32
  }
  func.func @transform_3(%arg0: i32) -> (i32, i32) {
    %c0_i32 = arith.constant 0 : i32
    %c0_i32_0 = arith.constant 0 : i32
    %c0_i32_1 = arith.constant 0 : i32
    return %c0_i32, %c0_i32_0 : i32, i32
  }
  func.func @transform_4(%arg0: i32) -> (i32, i32) {
    %c0_i32 = arith.constant 0 : i32
    %c0_i32_0 = arith.constant 0 : i32
    %c0_i32_1 = arith.constant 0 : i32
    return %c0_i32, %c0_i32_0 : i32, i32
  }
  func.func @transform_5(%arg0: i32) -> (i32, i32) {
    %c0_i32 = arith.constant 0 : i32
    %c0_i32_0 = arith.constant 0 : i32
    return %arg0, %c0_i32 : i32, i32
  }
}

</mosaic_0001>

<bundles_post_ra>
// kernel: tpu_custom_call.1
= control target key start
LH: loop header
LB: loop body
LE: loop exit
PB: predicated region body
PF: predicated region fallthrough
CT: control target
= control target key end

     0   :  { %10 = vsyncpa [#allocation3], 0  ;;  %s858_s0 = inlined_call_operand.vmem [shape: f32[16,32], index: 0, kind: input, shape index: {}]   ;;  %s859_s1 = inlined_call_operand.vmem [shape: bf16[32,128], index: 1, kind: input, shape index: {}]   ;;  %s860_s2 = inlined_call_operand.vmem [shape: f32[2,128], index: 2, kind: input, shape index: {}]   ;;  %s861_s3 = inlined_call_operand.vmem [shape: bf16[128,32], index: 3, kind: input, shape index: {}]   ;;  %s862_s4 = inlined_call_operand.vmem [shape: f32[3,32], index: 4, kind: input, shape index: {}]   ;;  %s863_s5 = inlined_call_operand.hbm [shape: f32[16,32], index: 5, kind: output, shape index: {}]  }
   0x1   :  { %12 = vsyncpa [#allocation3 + $0x1], 0  ;;  %s722_s18 = smov 0   ;;  %s724_s19 = smov 0  }
   0x2   :  { %s726_s20 = smov 0   ;;  %s728_s21 = smov 0  }
   0x3 LB: > { %s743_s22 = sadd.s32 4294967295, %s687_s21   ;;  %s508_s23 = sadd.s32 4294967294, %s687_s21   ;;  %s687_s21 = sphi %s728_s21, %s869_s21   ;;  %s683_s20 = sphi %s726_s20, %s868_s20   ;;  %s679_s19 = sphi %s724_s19, %s867_s19   ;;  %s675_s18 = sphi %s722_s18, %s866_s18  }
   0x4   : > { %s747_s24 = sadd.s32 1, %s687_s21   ;;  %s135_s25 = sadd.s32 1, %s683_s20 }
   0x5   : > { %s132_s26 = ssub.s32 %s687_s21, %s747_s24  ;;  %p145_p0 = scmp.ne.s32.totalorder %s683_s20, %s679_s19 }
   0x6   : > { %p133_p1 = scmp.eq.s32.totalorder %s132_s26, 0  ;;  %p146_p2 = scmp.eq.s32.totalorder %s743_s22, 1 }
   0x7   : > { %p151_p3 = scmp.ne.s32.totalorder %s679_s19, %s675_s18  ;;  %p152_p4 = scmp.eq.s32.totalorder %s508_s23, 1 }
   0x8   : > { %s758_s27 = scalar_select %p133_p1, %s683_s20, %s135_s25  }
   0x9   : > { %p760_p5 = por %p146_p2, %p145_p0  ;;  %p764_p6 = por %p152_p4, %p151_p3 }
   0xa   : > { %p511_p7 = scmp.ge.s32.totalorder %s687_s21, 1  ;;  %p189_p8 = scmp.lt.s32.totalorder %s687_s21, 3 }
   0xc   : > { %p190_p9 = pnand %p511_p7, %p189_p8 }
   0xd   : > { %p216_p10 = scmp.lt.s32.totalorder (!%p190_p9), %s743_s22, 1  ;;  %s213_s26 = sand.u32 (!%p190_p9), 1, %s679_s19  }
   0xe   : > { %193 = sbr.rel (%p190_p9) target bundleno = 607 (0x25f), region = 40  ;;  %s512_s30 = sshll.u32 (!%p190_p9), %s213_s26, 3 }
   0xf   : > { %s531_s10 = sshll.u32 (!%p190_p9), %s743_s22, 7  ;;  %s436_s16 = scalar_lea.sflag (!%p190_p9), [#allocation3], %s213_s26 }
  0x10   : > { %s447_s15 = scalar_lea.hbm (!%p190_p9), %s863_s5, %s531_s10  ;;  %s691_s23 = smov (!%p190_p9), [#allocation2]  }
  0x11   : > { %s631_s25 = sshll.u32 (!%p190_p9), %s691_s23, 4  ;;  %s632_s25 = int_to_ptr.vmem [resolvable:$false] %s631_s25 }
  0x13   : > { %v615_v0 = vld [vmem:[%s859_s1 + $0x8] sm:$0xff]   ;;  %v689_v1 = vmov 0.0   ;;  %v616_v2 = vld [vmem:[%s859_s1] sm:$0xff]   ;;  %vm690_vm0 = vmmov 0   ;;  %v617_v3 = vld [vmem:[%s861_s3 + $0x38] sm:$0xff]   ;;  %s217_s11 = scalar_select %p216_p10, %s743_s22, 1 }
  0x14   : > { %546 = vmatprep.subr.bf16.mxu0 %v689_v1  ;;  %554 = vmatprep.subr.bf16.mxu1 %v689_v1  ;;  %v618_v4 = vld [vmem:[%s861_s3 + $0x30] sm:$0xff]   ;;  %vm260_vm1 = vcmask 261120   ;;  %v619_v6 = vld [vmem:[%s861_s3 + $0x28] sm:$0xff]   ;;  %v620_v8 = vld [vmem:[%s861_s3 + $0x20] sm:$0xff]   ;;  %s633_s22 = scalar_lea.vmem %s632_s25, 256 }
  0x15   : > { %547 = vmatpush3.bf16.msra.mxu0 %v615_v0  ;;  %550 = vmatprep.mubr.msk.bf16.mxu0 %vm690_vm0, %v689_v1  ;;  %s513_s14 = sshll.u32 %s217_s11, 3  ;;  %v621_v9 = vld [vmem:[%s861_s3 + $0x18] sm:$0xff]   ;;  %v622_v10 = vld [vmem:[%s861_s3 + $0x10] sm:$0xff]   ;;  %v623_v11 = vld [vmem:[%s861_s3 + $0x8] sm:$0xff]   ;;  %s215_s11 = scalar_lea.vmem [#allocation2], %s512_s30 }
  0x16   : > { %548 = vmatprep.subr.bf16.mxu0 %v689_v1  ;;  %570 = vmatprep.mubr.msk.bf16.mxu1 %vm690_vm0, %v689_v1  ;;  %s219_s17 = scalar_lea.vmem %s858_s0, %s513_s14  ;;  %v624_v12 = vld [vmem:[%s861_s3] sm:$0xff]   ;;  %s449_s12 = sshll.u32 %s215_s11, 4  ;;  %s450_s12 = int_to_ptr.vmem [resolvable:$true] %s449_s12 }
  0x17   : > { %555 = vmatpush3.bf16.msra.mxu1 %v617_v3  ;;  %v221_v5 = vld [vmem:[%s219_s17] sm:$0xff]  ;;  %s627_s17 = scalar_lea.vmem %s450_s12, 128  ;;  %p634_p0 = scmp.lt.s32.totalorder %s450_s12, %s632_s25 }
  0x18   : > { %556 = vmatprep.subr.bf16.mxu1 %v689_v1  ;;  %v222_v7 = vpack.c.bf16 %v221_v5, %v221_v5  ;;  %v514_v13 = vld [vmem:[%s860_s2] ss:$0 sm:$0xff]  ;;  %v518_v15 = vld [vmem:[%s860_s2 + $0x1] ss:$0 sm:$0xff]  ;;  %v529_v44 = vld [vmem:[%s862_s4 + $0x2] ss:$0 sm:$0xff]  ;;  %p628_p11 = scmp.ne.s32.totalorder %s450_s12, %s627_s17  ;;  %p635_p1 = scmp.lt.s32.totalorder %s633_s22, %s627_s17 }
  0x19   : > { %549 = vmatpush3.bf16.msra.mxu0 %v616_v2  ;;  %v519_v23 = vld [vmem:[%s862_s4] ss:$0 sm:$0xff]  ;;  %v528_v42 = vld [vmem:[%s862_s4 + $0x1] ss:$0 sm:$0xff] }
  0x1a   : > { %p629_p12 = pnand %p628_p11, %p760_p5  ;;  %p636_p2 = por %p635_p1, %p634_p0 }
  0x1b   : > { %557 = vmatpush3.bf16.msra.mxu1 %v618_v4 }
  0x1c   : > { %558 = vmatprep.subr.bf16.mxu1 %v689_v1  ;;  %551 = vmatmul.mubr.msk.bf16.vlgmr.msra.gmra.mxu0 %vm260_vm1, %v222_v7  ;;  %p630_p13 = pneg %p629_p12 }
  0x1e   : > { %p637_p3 = pnand %p636_p2, %p630_p13 }
  0x1f   : > { %559 = vmatpush3.bf16.msra.mxu1 %v619_v6 }
  0x20   : > { %560 = vmatprep.subr.bf16.mxu1 %v689_v1 }
  0x23   : > { %561 = vmatpush3.bf16.msra.mxu1 %v620_v8 }
  0x24   : > { %562 = vmatprep.subr.bf16.mxu1 %v689_v1 }
  0x27   : > { %563 = vmatpush3.bf16.msra.mxu1 %v621_v9 }
  0x28   : > { %564 = vmatprep.subr.bf16.mxu1 %v689_v1 }
  0x2b   : > { %565 = vmatpush3.bf16.msra.mxu1 %v622_v10 }
  0x2c   : > { %566 = vmatprep.subr.bf16.mxu1 %v689_v1 }
  0x2f   : > { %567 = vmatpush3.bf16.msra.mxu1 %v623_v11 }
  0x30   : > { %568 = vmatprep.subr.bf16.mxu1 %v689_v1 }
  0x33   : > { %569 = vmatpush3.bf16.msra.mxu1 %v624_v12 }
  0xdc   : > { %v298_v14 = vpop.f32.mrf.mxu0 }
  0xdd   : > { %v299_v16 = vadd.f32 %v514_v13, %v298_v14 }
  0xde   : > { %v552_v17 = vpop.f32.mrf.mxu0 }
  0xdf   : > { %vm305_vm2 = vcmp.ge.f32.partialorder %v299_v16, 0.0  ;;  %v310_v18 = vmul.f32 %v518_v15, %v299_v16 }
  0xe0   : > { %v301_v19 = vpop.f32.mrf.mxu0 }
  0xe1   : > { %v311_v20 = vsel %vm305_vm2, %v299_v16, %v310_v18 }
  0xe2   : > { %v553_v21 = vpop.f32.mrf.mxu0  ;;  %v312_v22 = vpack.c.bf16 %v311_v20, %v311_v20 }
  0xe4   : > { %571 = vmatmul.mubr.bf16.vlgmr.msra.gmra.mxu1 %v312_v22 }
 0x1a4   : > { %v400_v24 = vpop.f32.mrf.mxu1 }
 0x1a5   : > { %v401_v25 = vadd.f32 %v519_v23, %v400_v24 }
 0x1a6   : > { %v572_v26 = vpop.f32.mrf.mxu1 }
 0x1a7   : > { %v406_v27 = vadd.f32 %v401_v25, %v221_v5 }
 0x1a8   : > { %v403_v28 = vpop.f32.mrf.mxu1 }
 0x1a9   : > { %v407_v29 = vsel %vm260_vm1, %v406_v27, 0.0  ;;  %v410_v30 = vmul.f32 %v406_v27, %v406_v27 }
 0x1aa   : > { %408 = vadd.xlane.f32.xlu0 %v407_v29  ;;  %v573_v31 = vpop.f32.mrf.mxu1 }
 0x1ab   : > { %v411_v32 = vsel %vm260_vm1, %v410_v30, 0.0 }
 0x1ae   : > { %412 = vadd.xlane.f32.xlu0 %v411_v32 }
 0x233   : > { %v409_v33 = vpop.xlane.xlu0 %408 }
 0x234   : > { %v414_v34 = vmul.f32 0.03125, %v409_v33 }
 0x236   : > { %v416_v36 = vmul.f32 %v414_v34, %v414_v34  ;;  %v420_v40 = vsub.f32 %v406_v27, %v414_v34 }
 0x237   : > { %v413_v35 = vpop.xlane.xlu0 %412 }
 0x238   : > { %v415_v37 = vmul.f32 0.03125, %v413_v35 }
 0x23a   : > { %v417_v38 = vsub.f32 %v415_v37, %v416_v36 }
 0x23c   : > { %v418_v39 = vadd.f32 1e-12, %v417_v38 }
 0x23e   : > { %625 = vrsqrt.f32 %v418_v39 }
 0x24b   : > { %v626_v41 = vpop.eup %625 }
 0x24c   : > { %v421_v43 = vmul.f32 %v626_v41, %v420_v40 }
 0x24e   : > { %v427_v45 = vmul.f32 %v528_v42, %v421_v43 }
 0x250   : > { %v433_v46 = vadd.f32 %v529_v44, %v427_v45 }
 0x252   : > { %434 = vst.msk [vmem:[%s215_s11] sm:$0xff] %vm260_vm1, %v433_v46 }
 0x253   : > { %640 = shalt.err (!%p637_p3)
}
 0x254   : > { %s641_s30 = scalar_lea.hbm %s447_s15, 128  ;;  %s645_s7 = scalar_lea.hbm %s863_s5, 256 }
 0x255   : > { %p642_p4 = scmp.ne.s32.totalorder %s447_s15, %s641_s30  ;;  %p646_p9 = scmp.lt.s32.totalorder %s447_s15, %s863_s5 }
 0x256   : > { %p647_p10 = scmp.lt.s32.totalorder %s645_s7, %s641_s30 }
 0x257   : > { %p643_p7 = pnand %p642_p4, %p760_p5 }
 0x258   : > { %p648_p11 = por %p647_p10, %p646_p9 }
 0x259   : > { %p644_p8 = pneg %p643_p7 }
 0x25b   : > { %p649_p12 = pnand %p648_p11, %p644_p8 }
 0x25d   : > { %652 = shalt.err (!%p649_p12)
}
 0x25e   : > { %574 = dma.vmem_to_hbm [thread:$0]  (%p760_p5), %s450_s12, 128, %s447_s15, %s436_s16  }
 0x25f PF: > { %p580_p13 = scmp.ge.s32.totalorder %s687_s21, 2  ;;  %s461_s10 = sand.u32 1, %s675_s18  }
 0x260   : > { %s462_s11 = scalar_lea.sflag [#allocation3], %s461_s10 }
 0x261   : > { %p577_p0 = pnand %p580_p13, %p764_p6 }
 0x263   : > { %p578_p1 = pneg %p577_p0 }
 0x265   : > { %670 = dma.done.wait (%p578_p1), %s462_s11, 128  }
 0x266   : > { %672 = vsyncadd (%p578_p1), %s462_s11, 4294967168  ;;  %p15_p2 = scmp.ge.s32.totalorder %s747_s24, 4   ;;  %s866_s18 = smov %s679_s19 }
 0x267   : > { %s867_s19 = smov %s683_s20  ;;  %s868_s20 = smov %s758_s27 }
 0x268   : > { %s869_s21 = smov %s747_s24  ;;  %17 = sbr.rel (!%p15_p2) target bundleno = 3 (0x3), region = 75 }
 0x26d   :  { %467 = vsyncpa [#allocation3], 1 }
 0x26e   :  { %469 = vsyncpa [#allocation3 + $0x1], 1 }

</bundles_post_ra>
